<compile_context>
chip_gen: v6e
topology: v6e:2x2x1
jax: 0.10.0
libtpu: 0.0.40
codegen_flags: <defaults>
</compile_context>

<pallas_src>
import functools

import jax
import jax.numpy as jnp
from jax import lax
from jax.experimental import pallas as pl
from jax.experimental.pallas import tpu as pltpu

_EPS = 1e-12
_NEG_INF = float("-inf")


def _round_up(x, m):
    return ((x + m - 1) // m) * m


# ----------------------------------------------------------------------------
# Pallas kernels
# ----------------------------------------------------------------------------
def _am_softmax_kernel(x_ref, w_ref, inv_w_ref, lab_ref, out_ref,
                       ix_ref, m_ref, l_ref, t_ref,
                       *, scale, margin, num_classes, tile_c):
    """AM-Softmax per-example loss, online-softmax over class tiles."""
    c = pl.program_id(1)
    nc = pl.num_programs(1)

    @pl.when(c == 0)
    def _init():
        # Embedding inverse norms, computed once per batch tile and cached.
        xf = x_ref[...].astype(jnp.float32)
        sq = jnp.sum(xf * xf, axis=-1, keepdims=True)
        ix_ref[...] = lax.rsqrt(jnp.maximum(sq, _EPS * _EPS))  # == 1/max(||x||,eps)
        m_ref[...] = jnp.full(m_ref.shape, _NEG_INF, jnp.float32)
        l_ref[...] = jnp.zeros(l_ref.shape, jnp.float32)
        t_ref[...] = jnp.zeros(t_ref.shape, jnp.float32)

    labels = lab_ref[...]                                      # (TILE_B, 1) int32

    # MXU matmul in the input dtype (bf16 stays bf16), f32 accumulation,
    # contracting directly on the shared D axis (no in-kernel transpose).
    raw = lax.dot_general(
        x_ref[...], w_ref[...],
        dimension_numbers=(((1,), (1,)), ((), ())),
        preferred_element_type=jnp.float32)                    # (TILE_B, TILE_C)

    # Cosine similarities: scale result rows by 1/||x|| and lanes by 1/||w||.
    cos = raw * ix_ref[...] * inv_w_ref[...]

    # Target / class-validity masks via lane iota offset by this class tile.
    class_ids = c * tile_c + lax.broadcasted_iota(jnp.int32, cos.shape, 1)
    is_tgt = class_ids == labels
    valid = class_ids < num_classes

    logits = scale * jnp.where(is_tgt, cos - margin, cos)
    logits = jnp.where(valid, logits, _NEG_INF)

    # Online softmax recurrence.
    m_prev = m_ref[...]
    m_new = jnp.maximum(m_prev, jnp.max(logits, axis=-1, keepdims=True))
    alpha = jnp.exp(m_prev - m_new)
    p = jnp.exp(logits - m_new)
    l_ref[...] = alpha * l_ref[...] + jnp.sum(p, axis=-1, keepdims=True)
    t_ref[...] = t_ref[...] + jnp.sum(jnp.where(is_tgt, logits, 0.0),
                                      axis=-1, keepdims=True)
    m_ref[...] = m_new

    @pl.when(c == nc - 1)
    def _finalize():
        # per-example CE = logsumexp - target_logit
        out_ref[...] = m_ref[...] + jnp.log(l_ref[...]) - t_ref[...]


def _ce_kernel(logits_ref, lab_ref, out_ref, m_ref, l_ref, t_ref,
               *, num_classes, tile_c):
    """Plain cross-entropy per-example loss, online-softmax over class tiles."""
    c = pl.program_id(1)
    nc = pl.num_programs(1)

    @pl.when(c == 0)
    def _init():
        m_ref[...] = jnp.full(m_ref.shape, _NEG_INF, jnp.float32)
        l_ref[...] = jnp.zeros(l_ref.shape, jnp.float32)
        t_ref[...] = jnp.zeros(t_ref.shape, jnp.float32)

    logits = logits_ref[...].astype(jnp.float32)               # (TILE_B, TILE_C)
    labels = lab_ref[...]                                      # (TILE_B, 1) int32

    class_ids = c * tile_c + lax.broadcasted_iota(jnp.int32, logits.shape, 1)
    is_tgt = class_ids == labels
    valid = class_ids < num_classes
    logits = jnp.where(valid, logits, _NEG_INF)

    m_prev = m_ref[...]
    m_new = jnp.maximum(m_prev, jnp.max(logits, axis=-1, keepdims=True))
    alpha = jnp.exp(m_prev - m_new)
    p = jnp.exp(logits - m_new)
    l_ref[...] = alpha * l_ref[...] + jnp.sum(p, axis=-1, keepdims=True)
    t_ref[...] = t_ref[...] + jnp.sum(jnp.where(is_tgt, logits, 0.0),
                                      axis=-1, keepdims=True)
    m_ref[...] = m_new

    @pl.when(c == nc - 1)
    def _finalize():
        out_ref[...] = m_ref[...] + jnp.log(l_ref[...]) - t_ref[...]


# ----------------------------------------------------------------------------
# Wrappers around pallas_call
# ----------------------------------------------------------------------------
def am_softmax_loss(embeddings, labels, weight, *, scale=30.0, margin=0.4,
                    tile_b=128, tile_c=512):
    B, D = embeddings.shape
    C, D2 = weight.shape
    assert D == D2

    tile_b = min(tile_b, _round_up(B, 8))
    tile_c = min(tile_c, _round_up(C, 128))
    B_pad = _round_up(B, tile_b)
    C_pad = _round_up(C, tile_c)

    x = embeddings
    if B_pad != B:
        x = jnp.pad(x, ((0, B_pad - B), (0, 0)))
    w = weight
    if C_pad != C:
        w = jnp.pad(w, ((0, C_pad - C), (0, 0)))

    lab = labels.astype(jnp.int32).reshape(B, 1)
    if B_pad != B:
        lab = jnp.pad(lab, ((0, B_pad - B), (0, 0)), constant_values=-1)

    # Class-weight inverse norms precomputed once (outside the per-tile path),
    # applied inside the kernel as a lane-wise scale on the matmul result.
    w_norm = jnp.sqrt(jnp.sum(weight.astype(jnp.float32) ** 2, axis=-1))
    inv_w = (1.0 / jnp.maximum(w_norm, _EPS)).reshape(1, C)
    if C_pad != C:
        inv_w = jnp.pad(inv_w, ((0, 0), (0, C_pad - C)))

    grid = (B_pad // tile_b, C_pad // tile_c)

    kernel = functools.partial(
        _am_softmax_kernel, scale=float(scale), margin=float(margin),
        num_classes=C, tile_c=tile_c)

    cost = pl.CostEstimate(
        flops=2 * B_pad * C_pad * D + 8 * B_pad * C_pad,
        transcendentals=B_pad * C_pad + B_pad,
        bytes_accessed=(x.size * x.dtype.itemsize + w.size * w.dtype.itemsize
                        + inv_w.size * 4 + lab.size * 4 + B_pad * 4))

    per_example = pl.pallas_call(
        kernel,
        out_shape=jax.ShapeDtypeStruct((B_pad, 1), jnp.float32),
        grid_spec=pltpu.PrefetchScalarGridSpec(
            num_scalar_prefetch=0,
            grid=grid,
            in_specs=[
                pl.BlockSpec((tile_b, D), lambda b, c: (b, 0)),   # embeddings
                pl.BlockSpec((tile_c, D), lambda b, c: (c, 0)),   # class weights
                pl.BlockSpec((1, tile_c), lambda b, c: (0, c)),   # 1/||w|| (lane-dense)
                pl.BlockSpec((tile_b, 1), lambda b, c: (b, 0)),   # labels
            ],
            out_specs=pl.BlockSpec((tile_b, 1), lambda b, c: (b, 0)),
            scratch_shapes=[pltpu.VMEM((tile_b, 1), jnp.float32)] * 4,
        ),
        compiler_params=pltpu.CompilerParams(
            dimension_semantics=("parallel", "arbitrary"),
            vmem_limit_bytes=32 * 1024 * 1024),
        cost_estimate=cost,
    )(x, w, inv_w, lab)

    # Mean over the *global* batch; padded rows are sliced off.
    return jnp.sum(per_example[:B, 0]) / B


def ce_loss(logits, labels, *, tile_b=128, tile_c=512):
    B, C = logits.shape

    tile_b = min(tile_b, _round_up(B, 8))
    tile_c = min(tile_c, _round_up(C, 128))
    B_pad = _round_up(B, tile_b)
    C_pad = _round_up(C, tile_c)

    lg = logits
    if (B_pad, C_pad) != (B, C):
        lg = jnp.pad(lg, ((0, B_pad - B), (0, C_pad - C)))

    lab = labels.astype(jnp.int32).reshape(B, 1)
    if B_pad != B:
        lab = jnp.pad(lab, ((0, B_pad - B), (0, 0)), constant_values=-1)

    grid = (B_pad // tile_b, C_pad // tile_c)

    kernel = functools.partial(_ce_kernel, num_classes=C, tile_c=tile_c)

    cost = pl.CostEstimate(
        flops=8 * B_pad * C_pad,
        transcendentals=B_pad * C_pad + B_pad,
        bytes_accessed=lg.size * lg.dtype.itemsize + lab.size * 4 + B_pad * 4)

    per_example = pl.pallas_call(
        kernel,
        out_shape=jax.ShapeDtypeStruct((B_pad, 1), jnp.float32),
        grid_spec=pltpu.PrefetchScalarGridSpec(
            num_scalar_prefetch=0,
            grid=grid,
            in_specs=[
                pl.BlockSpec((tile_b, tile_c), lambda b, c: (b, c)),  # logits
                pl.BlockSpec((tile_b, 1), lambda b, c: (b, 0)),       # labels
            ],
            out_specs=pl.BlockSpec((tile_b, 1), lambda b, c: (b, 0)),
            scratch_shapes=[pltpu.VMEM((tile_b, 1), jnp.float32)] * 3,
        ),
        compiler_params=pltpu.CompilerParams(
            dimension_semantics=("parallel", "arbitrary"),
            vmem_limit_bytes=32 * 1024 * 1024),
        cost_estimate=cost,
    )(lg, lab)

    return jnp.sum(per_example[:B, 0]) / B


# ----------------------------------------------------------------------------
# Loss interface mirroring the PyTorch module
# ----------------------------------------------------------------------------
class Loss:
    """Loss interface for all designed losses (JAX/Pallas version)."""

    def __init__(self, config):
        self.model = config['model']
        cfg = config['config']
        if self.model == 'AM-Softmax':
            self.scale = cfg.get('scale', 30.0)
            self.margin = cfg.get('margin', 0.4)
            self.embed_dim = cfg['embedding_size']
            self.num_classes = cfg['num_classes']
            # Deterministic synthetic class-weight init (would be a learned
            # nn.Parameter of shape (num_classes, embedding_size) in PyTorch).
            wkey = jax.random.PRNGKey(42)
            self.weight = jax.random.normal(
                wkey, (self.num_classes, self.embed_dim), jnp.float32)
        elif self.model == 'CELoss':
            pass
        else:
            raise NotImplementedError(self.model)

    def forward(self, batch):
        """Loss training graph."""
        assert 'embeddings' in batch or 'logits' in batch
        assert 'labels' in batch
        if batch.get('embeddings') is not None:
            assert self.model == 'AM-Softmax'
            return am_softmax_loss(batch['embeddings'], batch['labels'],
                                   self.weight, scale=self.scale,
                                   margin=self.margin)
        elif batch.get('logits') is not None:
            assert self.model == 'CELoss'
            return ce_loss(batch['logits'], batch['labels'])

    __call__ = forward

    def predict(self, batch):
        """Predict step for metric compute.

        # TODO(synk): PyTorch .predict delegates to the wrapped loss whose
        # exact return contract is not shown; we return the forward loss.
        """
        return self.forward(batch)


# ----------------------------------------------------------------------------
# Reference implementations (plain JAX) for sanity checking
# ----------------------------------------------------------------------------
def _ref_am_softmax(x, labels, w, scale, margin):
    x_n = x / jnp.maximum(jnp.linalg.norm(x, axis=-1, keepdims=True), _EPS)
    w_n = w / jnp.maximum(jnp.linalg.norm(w, axis=-1, keepdims=True), _EPS)
    cos = x_n @ w_n.T
    onehot = jax.nn.one_hot(labels, w.shape[0], dtype=jnp.float32)
    logits = scale * (cos - margin * onehot)
    logp = jax.nn.log_softmax(logits, axis=-1)
    return -jnp.mean(jnp.sum(logp * onehot, axis=-1))


def _ref_ce(logits, labels):
    logp = jax.nn.log_softmax(logits.astype(jnp.float32), axis=-1)
    onehot = jax.nn.one_hot(labels, logits.shape[-1], dtype=jnp.float32)
    return -jnp.mean(jnp.sum(logp * onehot, axis=-1))


if __name__ == "__main__":
    key = jax.random.PRNGKey(0)
    k_emb, k_lab, k_log, k_emb2, k_lab2, k_log2 = jax.random.split(key, 6)

    # --- Small shapes through the Loss interface (single tile) ---
    B, D, C = 8, 32, 16
    embeddings = jax.random.normal(k_emb, (B, D), jnp.float32)
    labels = jax.random.randint(k_lab, (B,), 0, C, jnp.int32)

    am_cfg = {'model': 'AM-Softmax',
              'config': {'embedding_size': D, 'num_classes': C,
                         'scale': 30.0, 'margin': 0.4}}
    am = Loss(am_cfg)
    am_out = jax.block_until_ready(am({'embeddings': embeddings,
                                       'labels': labels}))
    am_ref = _ref_am_softmax(embeddings, labels, am.weight, 30.0, 0.4)
    assert jnp.allclose(am_out, am_ref, rtol=1e-4, atol=1e-4), (am_out, am_ref)

    logits = jax.random.normal(k_log, (B, C), jnp.float32)
    ce_cfg = {'model': 'CELoss', 'config': {}}
    ce = Loss(ce_cfg)
    ce_out = jax.block_until_ready(ce({'logits': logits, 'labels': labels}))
    ce_ref = _ref_ce(logits, labels)
    assert jnp.allclose(ce_out, ce_ref, rtol=1e-4, atol=1e-4), (ce_out, ce_ref)

    # --- Multi-tile exercise (batch + class tiling, padding on both axes) ---
    B2, D2, C2 = 20, 48, 300
    emb2 = jax.random.normal(k_emb2, (B2, D2), jnp.float32)
    lab2 = jax.random.randint(k_lab2, (B2,), 0, C2, jnp.int32)
    w2 = jax.random.normal(jax.random.PRNGKey(7), (C2, D2), jnp.float32)

    am2 = jax.block_until_ready(
        am_softmax_loss(emb2, lab2, w2, scale=30.0, margin=0.4,
                        tile_b=8, tile_c=128))
    am2_ref = _ref_am_softmax(emb2, lab2, w2, 30.0, 0.4)
    assert jnp.allclose(am2, am2_ref, rtol=1e-4, atol=1e-4), (am2, am2_ref)

    log2 = jax.random.normal(k_log2, (B2, C2), jnp.float32)
    ce2 = jax.block_until_ready(ce_loss(log2, lab2, tile_b=8, tile_c=128))
    ce2_ref = _ref_ce(log2, lab2)
    assert jnp.allclose(ce2, ce2_ref, rtol=1e-4, atol=1e-4), (ce2, ce2_ref)

    print("KERNEL_OK")
</pallas_src>

<mosaic_0001>
module attributes {stable_mosaic.version = 11 : i64} {
  func.func @_am_softmax_kernel(%arg0: i32, %arg1: i32, %arg2: memref<8x32xf32, #tpu.memory_space<vmem>>, %arg3: memref<128x32xf32, #tpu.memory_space<vmem>>, %arg4: memref<1x128xf32, #tpu.memory_space<vmem>>, %arg5: memref<8x1xi32, #tpu.memory_space<vmem>>, %arg6: memref<8x1xf32, #tpu.memory_space<vmem>>, %arg7: memref<8x1xf32, #tpu.memory_space<vmem>>, %arg8: memref<8x1xf32, #tpu.memory_space<vmem>>, %arg9: memref<8x1xf32, #tpu.memory_space<vmem>>, %arg10: memref<8x1xf32, #tpu.memory_space<vmem>>) attributes {dimension_semantics = [#tpu.dimension_semantics<parallel>, #tpu.dimension_semantics<arbitrary>], iteration_bounds = array<i64: 1, 1>, scalar_prefetch = 0 : i64, scratch_operands = 4 : i64, tpu.core_type = #tpu.core_type<tc>, window_params = [{transform_indices = @transform_0, window_bounds = array<i64: 8, 32>}, {transform_indices = @transform_1, window_bounds = array<i64: 128, 32>}, {transform_indices = @transform_2, window_bounds = array<i64: 1, 128>}, {transform_indices = @transform_3, window_bounds = array<i64: 8, 1>}, {transform_indices = @transform_4, window_bounds = array<i64: 8, 1>}]} {
    %c0_i32 = arith.constant 0 : i32
    %0 = arith.cmpi eq, %arg1, %c0_i32 : i32
    %1 = arith.extui %0 : i1 to i32
    %c0_i32_0 = arith.constant 0 : i32
    %2 = arith.cmpi ne, %1, %c0_i32_0 : i32
    scf.if %2 {
      %c0_31 = arith.constant 0 : index
      %c0_32 = arith.constant 0 : index
      %54 = vector.load %arg2[%c0_31, %c0_32] : memref<8x32xf32, #tpu.memory_space<vmem>>, vector<8x32xf32>
      %55 = arith.mulf %54, %54 : vector<8x32xf32>
      %cst_33 = arith.constant dense<0.000000e+00> : vector<8xf32>
      %56 = vector.multi_reduction <add>, %55, %cst_33 [1] : vector<8x32xf32> to vector<8xf32>
      %57 = vector.shape_cast %56 : vector<8xf32> to vector<8x1xf32>
      %cst_34 = arith.constant 1.000000e-24 : f32
      %58 = vector.broadcast %cst_34 : f32 to vector<8x1xf32>
      %59 = arith.maximumf %57, %58 : vector<8x1xf32>
      %60 = math.rsqrt %59 : vector<8x1xf32>
      %c0_35 = arith.constant 0 : index
      %c0_36 = arith.constant 0 : index
      %61 = vector.load %arg7[%c0_35, %c0_36] : memref<8x1xf32, #tpu.memory_space<vmem>>, vector<8x1xf32>
      tpu.vector_store %arg7[%c0_35, %c0_36], %60 {strides = array<i32>} : memref<8x1xf32, #tpu.memory_space<vmem>>, vector<8x1xf32>,
      %cst_37 = arith.constant 0xFF800000 : f32
      %62 = vector.broadcast %cst_37 : f32 to vector<8x1xf32>
      %c0_38 = arith.constant 0 : index
      %c0_39 = arith.constant 0 : index
      %63 = vector.load %arg8[%c0_38, %c0_39] : memref<8x1xf32, #tpu.memory_space<vmem>>, vector<8x1xf32>
      tpu.vector_store %arg8[%c0_38, %c0_39], %62 {strides = array<i32>} : memref<8x1xf32, #tpu.memory_space<vmem>>, vector<8x1xf32>,
      %cst_40 = arith.constant 0.000000e+00 : f32
      %64 = vector.broadcast %cst_40 : f32 to vector<8x1xf32>
      %c0_41 = arith.constant 0 : index
      %c0_42 = arith.constant 0 : index
      %65 = vector.load %arg9[%c0_41, %c0_42] : memref<8x1xf32, #tpu.memory_space<vmem>>, vector<8x1xf32>
      tpu.vector_store %arg9[%c0_41, %c0_42], %64 {strides = array<i32>} : memref<8x1xf32, #tpu.memory_space<vmem>>, vector<8x1xf32>,
      %cst_43 = arith.constant 0.000000e+00 : f32
      %66 = vector.broadcast %cst_43 : f32 to vector<8x1xf32>
      %c0_44 = arith.constant 0 : index
      %c0_45 = arith.constant 0 : index
      %67 = vector.load %arg10[%c0_44, %c0_45] : memref<8x1xf32, #tpu.memory_space<vmem>>, vector<8x1xf32>
      tpu.vector_store %arg10[%c0_44, %c0_45], %66 {strides = array<i32>} : memref<8x1xf32, #tpu.memory_space<vmem>>, vector<8x1xf32>,
    } else {
    }
    %c0 = arith.constant 0 : index
    %c0_1 = arith.constant 0 : index
    %3 = vector.load %arg5[%c0, %c0_1] : memref<8x1xi32, #tpu.memory_space<vmem>>, vector<8x1xi32>
    %c0_2 = arith.constant 0 : index
    %c0_3 = arith.constant 0 : index
    %4 = vector.load %arg2[%c0_2, %c0_3] : memref<8x32xf32, #tpu.memory_space<vmem>>, vector<8x32xf32>
    %c0_4 = arith.constant 0 : index
    %c0_5 = arith.constant 0 : index
    %5 = vector.load %arg3[%c0_4, %c0_5] : memref<128x32xf32, #tpu.memory_space<vmem>>, vector<128x32xf32>
    %cst = arith.constant dense<0.000000e+00> : vector<8x128xf32>
    %6 = tpu.matmul %4, %5, %cst {dimension_numbers = #tpu.dot_dimension_numbers<[1], [1], [0], [0], [0, 0, 1, 0], [], []>} : vector<8x32xf32>, vector<128x32xf32>, vector<8x128xf32> -> vector<8x128xf32>
    %c0_6 = arith.constant 0 : index
    %c0_7 = arith.constant 0 : index
    %7 = vector.load %arg7[%c0_6, %c0_7] : memref<8x1xf32, #tpu.memory_space<vmem>>, vector<8x1xf32>
    %8 = vector.broadcast %7 : vector<8x1xf32> to vector<8x128xf32>
    %9 = arith.mulf %6, %8 : vector<8x128xf32>
    %c0_8 = arith.constant 0 : index
    %c0_9 = arith.constant 0 : index
    %10 = vector.load %arg4[%c0_8, %c0_9] : memref<1x128xf32, #tpu.memory_space<vmem>>, vector<1x128xf32>
    %11 = vector.broadcast %10 : vector<1x128xf32> to vector<8x128xf32>
    %12 = arith.mulf %9, %11 : vector<8x128xf32>
    %c128_i32 = arith.constant 128 : i32
    %13 = arith.muli %arg1, %c128_i32 : i32
    %14 = tpu.iota {dimensions = array<i32: 1>} : vector<8x128xi32>
    %15 = vector.broadcast %13 : i32 to vector<8x128xi32>
    %16 = arith.addi %15, %14 : vector<8x128xi32>
    %17 = vector.broadcast %3 : vector<8x1xi32> to vector<8x128xi32>
    %18 = arith.cmpi eq, %16, %17 : vector<8x128xi32>
    %c16_i32 = arith.constant 16 : i32
    %19 = vector.broadcast %c16_i32 : i32 to vector<8x128xi32>
    %20 = arith.cmpi slt, %16, %19 : vector<8x128xi32>
    %cst_10 = arith.constant 4.000000e-01 : f32
    %21 = vector.broadcast %cst_10 : f32 to vector<8x128xf32>
    %22 = arith.subf %12, %21 : vector<8x128xf32>
    %23 = arith.select %18, %22, %12 : vector<8x128xi1>, vector<8x128xf32>
    %cst_11 = arith.constant 3.000000e+01 : f32
    %24 = vector.broadcast %cst_11 : f32 to vector<8x128xf32>
    %25 = arith.mulf %24, %23 : vector<8x128xf32>
    %cst_12 = arith.constant 0xFF800000 : f32
    %26 = vector.broadcast %cst_12 : f32 to vector<8x128xf32>
    %27 = arith.select %20, %25, %26 : vector<8x128xi1>, vector<8x128xf32>
    %c0_13 = arith.constant 0 : index
    %c0_14 = arith.constant 0 : index
    %28 = vector.load %arg8[%c0_13, %c0_14] : memref<8x1xf32, #tpu.memory_space<vmem>>, vector<8x1xf32>
    %cst_15 = arith.constant dense<0xFF800000> : vector<8xf32>
    %29 = vector.multi_reduction <maximumf>, %27, %cst_15 [1] : vector<8x128xf32> to vector<8xf32>
    %30 = vector.shape_cast %29 : vector<8xf32> to vector<8x1xf32>
    %31 = arith.maximumf %28, %30 : vector<8x1xf32>
    %32 = arith.subf %28, %31 : vector<8x1xf32>
    %33 = math.exp %32 : vector<8x1xf32>
    %34 = vector.broadcast %31 : vector<8x1xf32> to vector<8x128xf32>
    %35 = arith.subf %27, %34 : vector<8x128xf32>
    %36 = math.exp %35 : vector<8x128xf32>
    %c0_16 = arith.constant 0 : index
    %c0_17 = arith.constant 0 : index
    %37 = vector.load %arg9[%c0_16, %c0_17] : memref<8x1xf32, #tpu.memory_space<vmem>>, vector<8x1xf32>
    %38 = arith.mulf %33, %37 : vector<8x1xf32>
    %cst_18 = arith.constant dense<0.000000e+00> : vector<8xf32>
    %39 = vector.multi_reduction <add>, %36, %cst_18 [1] : vector<8x128xf32> to vector<8xf32>
    %40 = vector.shape_cast %39 : vector<8xf32> to vector<8x1xf32>
    %41 = arith.addf %38, %40 : vector<8x1xf32>
    %c0_19 = arith.constant 0 : index
    %c0_20 = arith.constant 0 : index
    %42 = vector.load %arg9[%c0_19, %c0_20] : memref<8x1xf32, #tpu.memory_space<vmem>>, vector<8x1xf32>
    tpu.vector_store %arg9[%c0_19, %c0_20], %41 {strides = array<i32>} : memref<8x1xf32, #tpu.memory_space<vmem>>, vector<8x1xf32>,
    %c0_21 = arith.constant 0 : index
    %c0_22 = arith.constant 0 : index
    %43 = vector.load %arg10[%c0_21, %c0_22] : memref<8x1xf32, #tpu.memory_space<vmem>>, vector<8x1xf32>
    %cst_23 = arith.constant 0.000000e+00 : f32
    %44 = vector.broadcast %cst_23 : f32 to vector<8x128xf32>
    %45 = arith.select %18, %27, %44 : vector<8x128xi1>, vector<8x128xf32>
    %cst_24 = arith.constant dense<0.000000e+00> : vector<8xf32>
    %46 = vector.multi_reduction <add>, %45, %cst_24 [1] : vector<8x128xf32> to vector<8xf32>
    %47 = vector.shape_cast %46 : vector<8xf32> to vector<8x1xf32>
    %48 = arith.addf %43, %47 : vector<8x1xf32>
    %c0_25 = arith.constant 0 : index
    %c0_26 = arith.constant 0 : index
    %49 = vector.load %arg10[%c0_25, %c0_26] : memref<8x1xf32, #tpu.memory_space<vmem>>, vector<8x1xf32>
    tpu.vector_store %arg10[%c0_25, %c0_26], %48 {strides = array<i32>} : memref<8x1xf32, #tpu.memory_space<vmem>>, vector<8x1xf32>,
    %c0_27 = arith.constant 0 : index
    %c0_28 = arith.constant 0 : index
    %50 = vector.load %arg8[%c0_27, %c0_28] : memref<8x1xf32, #tpu.memory_space<vmem>>, vector<8x1xf32>
    tpu.vector_store %arg8[%c0_27, %c0_28], %31 {strides = array<i32>} : memref<8x1xf32, #tpu.memory_space<vmem>>, vector<8x1xf32>,
    %c0_i32_29 = arith.constant 0 : i32
    %51 = arith.cmpi eq, %arg1, %c0_i32_29 : i32
    %52 = arith.extui %51 : i1 to i32
    %c0_i32_30 = arith.constant 0 : i32
    %53 = arith.cmpi ne, %52, %c0_i32_30 : i32
    scf.if %53 {
      %c0_31 = arith.constant 0 : index
      %c0_32 = arith.constant 0 : index
      %54 = vector.load %arg8[%c0_31, %c0_32] : memref<8x1xf32, #tpu.memory_space<vmem>>, vector<8x1xf32>
      %c0_33 = arith.constant 0 : index
      %c0_34 = arith.constant 0 : index
      %55 = vector.load %arg9[%c0_33, %c0_34] : memref<8x1xf32, #tpu.memory_space<vmem>>, vector<8x1xf32>
      %56 = math.log %55 : vector<8x1xf32>
      %57 = arith.addf %54, %56 : vector<8x1xf32>
      %c0_35 = arith.constant 0 : index
      %c0_36 = arith.constant 0 : index
      %58 = vector.load %arg10[%c0_35, %c0_36] : memref<8x1xf32, #tpu.memory_space<vmem>>, vector<8x1xf32>
      %59 = arith.subf %57, %58 : vector<8x1xf32>
      %c0_37 = arith.constant 0 : index
      %c0_38 = arith.constant 0 : index
      %60 = vector.load %arg6[%c0_37, %c0_38] : memref<8x1xf32, #tpu.memory_space<vmem>>, vector<8x1xf32>
      tpu.vector_store %arg6[%c0_37, %c0_38], %59 {strides = array<i32>} : memref<8x1xf32, #tpu.memory_space<vmem>>, vector<8x1xf32>,
    } else {
    }
    return
  }
  func.func @transform_0(%arg0: i32, %arg1: i32) -> (i32, i32) {
    %c0_i32 = arith.constant 0 : i32
    %c0_i32_0 = arith.constant 0 : i32
    return %arg0, %c0_i32 : i32, i32
  }
  func.func @transform_1(%arg0: i32, %arg1: i32) -> (i32, i32) {
    %c0_i32 = arith.constant 0 : i32
    %c0_i32_0 = arith.constant 0 : i32
    return %arg1, %c0_i32 : i32, i32
  }
  func.func @transform_2(%arg0: i32, %arg1: i32) -> (i32, i32) {
    %c0_i32 = arith.constant 0 : i32
    %c0_i32_0 = arith.constant 0 : i32
    return %c0_i32, %arg1 : i32, i32
  }
  func.func @transform_3(%arg0: i32, %arg1: i32) -> (i32, i32) {
    %c0_i32 = arith.constant 0 : i32
    %c0_i32_0 = arith.constant 0 : i32
    return %arg0, %c0_i32 : i32, i32
  }
  func.func @transform_4(%arg0: i32, %arg1: i32) -> (i32, i32) {
    %c0_i32 = arith.constant 0 : i32
    %c0_i32_0 = arith.constant 0 : i32
    return %arg0, %c0_i32 : i32, i32
  }
}

</mosaic_0001>

<bundles_post_ra>
// kernel: tpu_custom_call.1
= control target key start
LH: loop header
LB: loop body
LE: loop exit
PB: predicated region body
PF: predicated region fallthrough
CT: control target
= control target key end

     0   :  { %vm29_vm0 = vcmask 7168   ;;  %vm23_vm1 = vcmask 261120   ;;  %v332_v1 = vmov 0.0   ;;  %vm333_vm2 = vmmov 0   ;;  %s452_s0 = inlined_call_operand.vmem [shape: f32[8,32], index: 0, kind: input, shape index: {}]   ;;  %s453_s1 = inlined_call_operand.vmem [shape: f32[128,32], index: 1, kind: input, shape index: {}]   ;;  %s454_s3 = inlined_call_operand.vmem [shape: s32[8,1], index: 3, kind: input, shape index: {}]   ;;  %s455_s2 = inlined_call_operand.vmem [shape: f32[1,128], index: 2, kind: input, shape index: {}]   ;;  %s456_s4 = inlined_call_operand.vmem [shape: f32[8,1], index: 4, kind: output, shape index: {}]  }
   0x1   :  { %v364_v0 = vld [vmem:[%s452_s0] sm:$0xff]  ;;  %283 = vmatprep.subr.mxu0 %v332_v1  ;;  %v51_v2 = vld [vmem:[%s453_s1 + $0x78] sm:$0xff]  ;;  %315 = vmatprep.mubr.msk.f32.mxu0 %vm333_vm2, %v332_v1  ;;  %32 = vst.msk [vmem:[#allocation4] sm:$0xff] %vm29_vm0, %v332_v1  ;;  %33 = vst.msk [vmem:[#allocation5] sm:$0xff] %vm29_vm0, %v332_v1  ;;  %v334_v13 = vmov 0   ;;  %v335_v26 = vmov -inf   ;;  %v190_v29 = vlaneseq }
   0x2   :  { %v22_v3 = vmul.f32 %v364_v0, %v364_v0  ;;  %284 = vmatpush3.xpose.msk.msra.mxu0 %vm23_vm1, %v51_v2  ;;  %v50_v4 = vld [vmem:[%s453_s1 + $0x70] sm:$0xff]  ;;  %v49_v6 = vld [vmem:[%s453_s1 + $0x68] sm:$0xff]  ;;  %v48_v7 = vld [vmem:[%s453_s1 + $0x60] sm:$0xff]  ;;  %322 = vset.pattern.permute.xlu0 %v334_v13  ;;  %31 = vst.msk [vmem:[#allocation3] sm:$0xff] %vm29_vm0, %v335_v26 }
   0x3   :  { %285 = vmatprep.subr.mxu0 %v332_v1  ;;  %v47_v8 = vld [vmem:[%s453_s1 + $0x58] sm:$0xff]  ;;  %v46_v9 = vld [vmem:[%s453_s1 + $0x50] sm:$0xff]  ;;  %v45_v10 = vld [vmem:[%s453_s1 + $0x48] sm:$0xff]  ;;  %323 = vset.pattern.permute.xlu1 %v334_v13  ;;  %v191_v32 = vand.u32 127, %v190_v29 }
   0x4   :  { %v24_v5 = vsel %vm23_vm1, %v22_v3, 0.0  ;;  %v44_v11 = vld [vmem:[%s453_s1 + $0x40] sm:$0xff]  ;;  %v43_v12 = vld [vmem:[%s453_s1 + $0x38] sm:$0xff]  ;;  %v42_v14 = vld [vmem:[%s453_s1 + $0x30] sm:$0xff] }
   0x5   :  { %25 = vadd.xlane.f32.xlu0 %v24_v5  ;;  %v41_v15 = vld [vmem:[%s453_s1 + $0x28] sm:$0xff]  ;;  %v34_v16 = vld [vmem:[%s454_s3] sm:$0xff]  ;;  %v39_v18 = vld [vmem:[%s453_s1 + $0x18] sm:$0xff]  ;;  %vm198_vm4 = vcmp.lt.s32.totalorder %v191_v32, 16 }
   0x6   :  { %286 = vmatpush3.xpose.msk.msra.mxu0 %vm23_vm1, %v50_v4  ;;  %195 = vperm.xlu1 %323, %v34_v16   ;;  %v40_v17 = vld [vmem:[%s453_s1 + $0x20] sm:$0xff]  ;;  %v38_v19 = vld [vmem:[%s453_s1 + $0x10] sm:$0xff]  ;;  %v37_v20 = vld [vmem:[%s453_s1 + $0x8] sm:$0xff] }
   0x7   :  { %287 = vmatprep.subr.mxu0 %v332_v1  ;;  %v36_v21 = vld [vmem:[%s453_s1] sm:$0xff] }
   0x8   :  { %v264_v30 = vld [vmem:[%s455_s2] ss:$0 sm:$0xff]  ;;  %v225_v49 = vld [vmem:[#allocation5] sm:$0xff]  ;;  %v218_v54 = vld [vmem:[#allocation4] sm:$0xff] }
   0x9   :  { %v203_v40 = vld [vmem:[#allocation3] sm:$0xff] }
   0xa   :  { %288 = vmatpush3.xpose.msk.msra.mxu0 %vm23_vm1, %v49_v6 }
   0xb   :  { %289 = vmatprep.subr.mxu0 %v332_v1 }
   0xe   :  { %290 = vmatpush3.xpose.msk.msra.mxu0 %vm23_vm1, %v48_v7 }
   0xf   :  { %291 = vmatprep.subr.mxu0 %v332_v1 }
  0x12   :  { %292 = vmatpush3.xpose.msk.msra.mxu0 %vm23_vm1, %v47_v8 }
  0x13   :  { %293 = vmatprep.subr.mxu0 %v332_v1 }
  0x16   :  { %294 = vmatpush3.xpose.msk.msra.mxu0 %vm23_vm1, %v46_v9 }
  0x17   :  { %295 = vmatprep.subr.mxu0 %v332_v1 }
  0x1a   :  { %296 = vmatpush3.xpose.msk.msra.mxu0 %vm23_vm1, %v45_v10 }
  0x1b   :  { %297 = vmatprep.subr.mxu0 %v332_v1 }
  0x1e   :  { %298 = vmatpush3.xpose.msk.msra.mxu0 %vm23_vm1, %v44_v11 }
  0x1f   :  { %299 = vmatprep.subr.mxu0 %v332_v1 }
  0x22   :  { %300 = vmatpush3.xpose.msk.msra.mxu0 %vm23_vm1, %v43_v12 }
  0x23   :  { %301 = vmatprep.subr.mxu0 %v332_v1 }
  0x26   :  { %302 = vmatpush3.xpose.msk.msra.mxu0 %vm23_vm1, %v42_v14 }
  0x27   :  { %303 = vmatprep.subr.mxu0 %v332_v1 }
  0x2a   :  { %304 = vmatpush3.xpose.msk.msra.mxu0 %vm23_vm1, %v41_v15 }
  0x2b   :  { %305 = vmatprep.subr.mxu0 %v332_v1 }
  0x2e   :  { %306 = vmatpush3.xpose.msk.msra.mxu0 %vm23_vm1, %v40_v17 }
  0x2f   :  { %307 = vmatprep.subr.mxu0 %v332_v1 }
  0x32   :  { %308 = vmatpush3.xpose.msk.msra.mxu0 %vm23_vm1, %v39_v18 }
  0x33   :  { %309 = vmatprep.subr.mxu0 %v332_v1 }
  0x36   :  { %310 = vmatpush3.xpose.msk.msra.mxu0 %vm23_vm1, %v38_v19 }
  0x37   :  { %311 = vmatprep.subr.mxu0 %v332_v1 }
  0x3a   :  { %312 = vmatpush3.xpose.msk.msra.mxu0 %vm23_vm1, %v37_v20 }
  0x3b   :  { %313 = vmatprep.subr.mxu0 %v332_v1 }
  0x3e   :  { %314 = vmatpush3.xpose.msk.msra.mxu0 %vm23_vm1, %v36_v21 }
  0x41   :  { %316 = vmatmul.mubr.msk.f32.vlgmr.msra.gmra.mxu0 %vm23_vm1, %v364_v0 }
  0x81   :  { %v196_v34 = vpop.permute.xlu1 %195 }
  0x82   :  { %vm197_vm3 = vcmp.eq.s32.totalorder %v191_v32, %v196_v34 }
  0x8e   :  { %v26_v22 = vpop.xlane.xlu0 %25 }
  0x8f   :  { %v27_v23 = vmax.f32 %v26_v22, 1e-24 }
  0x91   :  { %324 = vrsqrt.f32 %v27_v23 }
  0x9e   :  { %v325_v24 = vpop.eup %324 }
  0x9f   :  { %30 = vst.msk [vmem:[#allocation2] sm:$0xff] %vm29_vm0, %v325_v24 }
  0xa6   :  { %v174_v25 = vld [vmem:[#allocation2] sm:$0xff] }
  0xa7   :  { %177 = vperm.xlu0 %322, %v174_v25  }
 0x101   :  { %v170_v27 = vpop.f32.mrf.mxu0 }
 0x103   :  { %v317_v28 = vpop.f32.mrf.mxu0 }
 0x122   :  { %v178_v31 = vpop.permute.xlu0 %177 }
 0x123   :  { %v180_v33 = vmul.f32 %v178_v31, %v170_v27 }
 0x125   :  { %v188_v35 = vmul.f32 %v264_v30, %v180_v33 }
 0x127   :  { %v265_v36 = vadd.f32 -0.4, %v188_v35 }
 0x129   :  { %v200_v37 = vsel %vm197_vm3, %v265_v36, %v188_v35 }
 0x12a   :  { %v201_v38 = vmul.f32 30.0, %v200_v37 }
 0x12c   :  { %v202_v39 = vsel %vm198_vm4, %v201_v38, -inf }
 0x12d   :  { %204 = vmax.xlane.f32.xlu1 %v202_v39  ;;  %v226_v44 = vsel %vm197_vm3, %v202_v39, 0.0 }
 0x1b6   :  { %v205_v41 = vpop.xlane.xlu1 %204 }
 0x1b7   :  { %v206_v42 = vmax.f32 %v203_v40, %v205_v41 }
 0x1b9   :  { %v207_v43 = vsub.f32 %v203_v40, %v206_v42  ;;  %231 = vst.msk [vmem:[#allocation3] sm:$0xff] %vm29_vm0, %v206_v42  ;;  %212 = vperm.xlu1 %323, %v206_v42  }
 0x1bb   :  { %v208_v52 = vmul.f32 1.442695, %v207_v43 }
 0x1c0   :  { %v235_v61 = vld [vmem:[#allocation3] sm:$0xff] }
 0x1dd   :  { %227 = vadd.xlane.f32.xlu1 %v226_v44 }
 0x234   :  { %v213_v45 = vpop.permute.xlu1 %212 }
 0x235   :  { %v215_v46 = vsub.f32 %v202_v39, %v213_v45 }
 0x237   :  { %v216_v47 = vmul.f32 1.442695, %v215_v46 }
 0x239   :  { %326 = vpow2.f32 %v216_v47 }
 0x23a   :  { %328 = vpow2.f32 %v208_v52 }
 0x246   :  { %v327_v48 = vpop.eup %326 }
 0x247   :  { %220 = vadd.xlane.f32.xlu0 %v327_v48  ;;  %v329_v53 = vpop.eup %328 }
 0x248   :  { %v219_v55 = vmul.f32 %v329_v53, %v218_v54 }
 0x266   :  { %v228_v50 = vpop.xlane.xlu1 %227 }
 0x267   :  { %v229_v51 = vadd.f32 %v228_v50, %v225_v49 }
 0x269   :  { %230 = vst.msk [vmem:[#allocation5] sm:$0xff] %vm29_vm0, %v229_v51 }
 0x270   :  { %v240_v63 = vld [vmem:[#allocation5] sm:$0xff] }
 0x2d0   :  { %v221_v56 = vpop.xlane.xlu0 %220 }
 0x2d1   :  { %v222_v57 = vadd.f32 %v221_v56, %v219_v55 }
 0x2d3   :  { %224 = vst.msk [vmem:[#allocation4] sm:$0xff] %vm29_vm0, %v222_v57 }
 0x2da   :  { %v236_v58 = vld [vmem:[#allocation4] sm:$0xff] }
 0x2db   :  { %330 = vlog2.f32 %v236_v58 }
 0x2e8   :  { %v331_v59 = vpop.eup %330 }
 0x2e9   :  { %v238_v60 = vmul.f32 0.6931472, %v331_v59 }
 0x2eb   :  { %v239_v62 = vadd.f32 %v238_v60, %v235_v61 }
 0x2ed   :  { %v241_v0 = vsub.f32 %v239_v62, %v240_v63 }
 0x2ef   :  { %242 = vst.msk [vmem:[%s456_s4] sm:$0xff] %vm29_vm0, %v241_v0 }

</bundles_post_ra>
